<compile_context>
chip_gen: v6e
topology: v6e:2x2x1
jax: 0.10.0
libtpu: 0.0.40
codegen_flags: <defaults>
</compile_context>

<pallas_src>
import functools

import jax
import jax.numpy as jnp
from jax.experimental import pallas as pl
from jax.experimental.pallas import tpu as pltpu


def _gdn_kernel(x_ref, gamma_ref, beta_ref, o_ref, *, inverse):
    # x_ref: (1, C, T) tile; gamma_ref: (C, C) f32 (resident); beta_ref: (C, 1) f32.
    xf = x_ref[0].astype(jnp.float32)                 # (C, T)
    x2 = xf * xf
    # 1x1 conv over channels == matmul on the channel axis (MXU path).
    norm = jnp.dot(gamma_ref[...], x2, preferred_element_type=jnp.float32)
    norm = norm + beta_ref[...]                       # (C, 1) broadcasts over lanes
    if inverse:
        y = xf * jnp.sqrt(norm)
    else:
        y = xf * jax.lax.rsqrt(norm)                  # one EUP pass vs sqrt + div
    o_ref[0] = y.astype(o_ref.dtype)


def _pick_hw_tile(hw, max_tile=2048):
    """Pick a lane tile (multiple of 128, or the full extent) and the padded hw."""
    if hw <= max_tile:
        return hw, hw                                 # single block == full dim
    for t in (2048, 1792, 1536, 1280, 1024, 896, 768, 640, 512, 384, 256, 128):
        if t <= max_tile and hw % t == 0:
            return t, hw                              # exact tiling, no padding
    t = min(1024, max_tile)
    return t, pl.cdiv(hw, t) * t                      # ragged tail -> pad


def gdn_forward(x, beta_param, gamma_param, *, inverse=False,
                beta_min=1e-6, reparam_offset=2 ** (-18), max_tile_hw=2048):
    """Reproduces GDN.forward for a 4-D (NCHW) or 5-D (NCDWH) input."""
    orig_shape = x.shape
    if x.ndim == 5:
        b, c = x.shape[:2]
        x = x.reshape(b, c, -1)
    elif x.ndim == 4:
        b, c, h, w = x.shape
        x = x.reshape(b, c, h * w)
    else:
        raise ValueError("GDN expects a 4-D or 5-D input")
    hw = x.shape[-1]

    pedestal = reparam_offset ** 2
    beta_bound = (beta_min + pedestal) ** 0.5
    gamma_bound = reparam_offset

    # LowerBound.forward == elementwise max with the bound (tiny glue, plain JAX).
    # Hoisted to f32 once here so the kernel body never re-casts per grid step.
    beta = (jnp.maximum(beta_param, beta_bound).astype(jnp.float32) ** 2
            - pedestal).reshape(c, 1)                                  # (C, 1)
    gamma = (jnp.maximum(gamma_param, gamma_bound).astype(jnp.float32) ** 2
             - pedestal)                                               # (C, C)

    tile_hw, hw_pad = _pick_hw_tile(hw, max_tile_hw)
    if hw_pad != hw:
        # Zero-padded pixels give norm = beta > 0 (no NaNs); sliced off below.
        x = jnp.pad(x, ((0, 0), (0, 0), (0, hw_pad - hw)))

    kernel = functools.partial(_gdn_kernel, inverse=inverse)

    out = pl.pallas_call(
        kernel,
        out_shape=jax.ShapeDtypeStruct((b, c, hw_pad), x.dtype),
        grid_spec=pltpu.PrefetchScalarGridSpec(
            num_scalar_prefetch=0,
            grid=(b, hw_pad // tile_hw),
            in_specs=[
                pl.BlockSpec((1, c, tile_hw), lambda bi, pi: (bi, 0, pi)),  # x tile
                pl.BlockSpec((c, c), lambda bi, pi: (0, 0)),                # gamma
                pl.BlockSpec((c, 1), lambda bi, pi: (0, 0)),                # beta
            ],
            out_specs=pl.BlockSpec((1, c, tile_hw), lambda bi, pi: (bi, 0, pi)),
        ),
        compiler_params=pltpu.CompilerParams(
            dimension_semantics=("parallel", "parallel")),
    )(x, gamma, beta)

    if hw_pad != hw:
        out = out[:, :, :hw]
    return out.reshape(orig_shape)


def _init_gdn_params(ch, gamma_init=0.1, reparam_offset=2 ** (-18)):
    """Deterministic parameter init matching GDN.build()."""
    pedestal = reparam_offset ** 2
    beta = jnp.sqrt(jnp.ones((ch,), jnp.float32) + pedestal)
    g = gamma_init * jnp.eye(ch, dtype=jnp.float32) + pedestal
    gamma = jnp.sqrt(g)
    return beta, gamma


def _gdn_reference(x, beta_param, gamma_param, *, inverse=False,
                   beta_min=1e-6, reparam_offset=2 ** (-18)):
    """Pure-JAX reference mirroring the PyTorch forward (for validation)."""
    pedestal = reparam_offset ** 2
    beta_bound = (beta_min + pedestal) ** 0.5
    gamma_bound = reparam_offset
    beta = jnp.maximum(beta_param, beta_bound) ** 2 - pedestal
    gamma = jnp.maximum(gamma_param, gamma_bound) ** 2 - pedestal
    norm = jnp.einsum('ij,bjhw->bihw', gamma, x * x) + beta[None, :, None, None]
    norm = jnp.sqrt(norm)
    return x * norm if inverse else x / norm


if __name__ == "__main__":
    ch = 4
    key = jax.random.PRNGKey(0)
    x = jax.random.normal(key, (2, ch, 16, 16), dtype=jnp.float32)

    beta_p, gamma_p = _init_gdn_params(ch)

    out = gdn_forward(x, beta_p, gamma_p, inverse=False)
    out = jax.block_until_ready(out)
    ref = _gdn_reference(x, beta_p, gamma_p, inverse=False)
    assert out.shape == x.shape and out.dtype == x.dtype
    assert jnp.allclose(out, ref, atol=1e-5, rtol=1e-5)

    out_i = gdn_forward(x, beta_p, gamma_p, inverse=True)
    out_i = jax.block_until_ready(out_i)
    ref_i = _gdn_reference(x, beta_p, gamma_p, inverse=True)
    assert jnp.allclose(out_i, ref_i, atol=1e-5, rtol=1e-5)

    print("KERNEL_OK")
</pallas_src>

<mosaic_0001>
module attributes {stable_mosaic.version = 11 : i64} {
  func.func @_gdn_kernel(%arg0: i32, %arg1: i32, %arg2: memref<1x4x256xf32, #tpu.memory_space<vmem>>, %arg3: memref<4x4xf32, #tpu.memory_space<vmem>>, %arg4: memref<4x1xf32, #tpu.memory_space<vmem>>, %arg5: memref<1x4x256xf32, #tpu.memory_space<vmem>>) attributes {dimension_semantics = [#tpu.dimension_semantics<parallel>, #tpu.dimension_semantics<parallel>], iteration_bounds = array<i64: 2, 1>, scalar_prefetch = 0 : i64, scratch_operands = 0 : i64, tpu.core_type = #tpu.core_type<tc>, window_params = [{transform_indices = @transform_0, window_bounds = array<i64: 1, 4, 256>}, {pipeline_mode = #tpu.pipeline_mode<synchronous>, transform_indices = @transform_1, window_bounds = array<i64: 4, 4>}, {pipeline_mode = #tpu.pipeline_mode<synchronous>, transform_indices = @transform_2, window_bounds = array<i64: 4, 1>}, {transform_indices = @transform_3, window_bounds = array<i64: 1, 4, 256>}]} {
    %c0 = arith.constant 0 : index
    %c0_0 = arith.constant 0 : index
    %c0_1 = arith.constant 0 : index
    %0 = vector.load %arg2[%c0, %c0_0, %c0_1] : memref<1x4x256xf32, #tpu.memory_space<vmem>>, vector<1x4x256xf32>
    %1 = vector.shape_cast %0 : vector<1x4x256xf32> to vector<4x256xf32>
    %2 = arith.mulf %1, %1 : vector<4x256xf32>
    %c0_2 = arith.constant 0 : index
    %c0_3 = arith.constant 0 : index
    %3 = vector.load %arg3[%c0_2, %c0_3] : memref<4x4xf32, #tpu.memory_space<vmem>>, vector<4x4xf32>
    %cst = arith.constant dense<0.000000e+00> : vector<4x256xf32>
    %4 = tpu.matmul %3, %2, %cst {dimension_numbers = #tpu.dot_dimension_numbers<[1], [0], [0], [1], [0, 0, 1, 1], [], []>} : vector<4x4xf32>, vector<4x256xf32>, vector<4x256xf32> -> vector<4x256xf32>
    %c0_4 = arith.constant 0 : index
    %c0_5 = arith.constant 0 : index
    %5 = vector.load %arg4[%c0_4, %c0_5] : memref<4x1xf32, #tpu.memory_space<vmem>>, vector<4x1xf32>
    %6 = vector.broadcast %5 : vector<4x1xf32> to vector<4x256xf32>
    %7 = arith.addf %4, %6 : vector<4x256xf32>
    %8 = math.rsqrt %7 : vector<4x256xf32>
    %9 = arith.mulf %1, %8 : vector<4x256xf32>
    %c0_6 = arith.constant 0 : index
    %c0_7 = arith.constant 0 : index
    %c0_8 = arith.constant 0 : index
    %10 = vector.load %arg5[%c0_6, %c0_7, %c0_8] : memref<1x4x256xf32, #tpu.memory_space<vmem>>, vector<1x4x256xf32>
    %11 = vector.shape_cast %10 : vector<1x4x256xf32> to vector<4x256xf32>
    %12 = vector.shape_cast %9 : vector<4x256xf32> to vector<1x4x256xf32>
    tpu.vector_store %arg5[%c0_6, %c0_7, %c0_8], %12 {strides = array<i32>} : memref<1x4x256xf32, #tpu.memory_space<vmem>>, vector<1x4x256xf32>,
    return
  }
  func.func @transform_0(%arg0: i32, %arg1: i32) -> (i32, i32, i32) {
    %c0_i32 = arith.constant 0 : i32
    %c0_i32_0 = arith.constant 0 : i32
    return %arg0, %c0_i32, %arg1 : i32, i32, i32
  }
  func.func @transform_1(%arg0: i32, %arg1: i32) -> (i32, i32) {
    %c0_i32 = arith.constant 0 : i32
    %c0_i32_0 = arith.constant 0 : i32
    %c0_i32_1 = arith.constant 0 : i32
    return %c0_i32, %c0_i32_0 : i32, i32
  }
  func.func @transform_2(%arg0: i32, %arg1: i32) -> (i32, i32) {
    %c0_i32 = arith.constant 0 : i32
    %c0_i32_0 = arith.constant 0 : i32
    %c0_i32_1 = arith.constant 0 : i32
    return %c0_i32, %c0_i32_0 : i32, i32
  }
  func.func @transform_3(%arg0: i32, %arg1: i32) -> (i32, i32, i32) {
    %c0_i32 = arith.constant 0 : i32
    %c0_i32_0 = arith.constant 0 : i32
    return %arg0, %c0_i32, %arg1 : i32, i32, i32
  }
}

</mosaic_0001>

<bundles_post_ra>
// kernel: tpu_custom_call.1
= control target key start
LH: loop header
LB: loop body
LE: loop exit
PB: predicated region body
PF: predicated region fallthrough
CT: control target
= control target key end

     0   :  { %8 = vsyncpa [#allocation3], 0  ;;  %s774_s0 = inlined_call_operand.hbm [shape: f32[2,4,256], index: 0, kind: input, shape index: {}]   ;;  %s775_s1 = inlined_call_operand.vmem [shape: f32[4,4], index: 1, kind: input, shape index: {}]   ;;  %s776_s2 = inlined_call_operand.vmem [shape: f32[4,1], index: 2, kind: input, shape index: {}]   ;;  %s777_s3 = inlined_call_operand.hbm [shape: f32[2,4,256], index: 3, kind: output, shape index: {}]  }
   0x1   :  { %10 = vsyncpa [#allocation3 + $0x1], 0 }
   0x2   :  { %11 = vsyncpa [#allocation4], 0 }
   0x3   :  { %13 = vsyncpa [#allocation4 + $0x1], 0  ;;  %s630_s12 = smov 0   ;;  %s632_s13 = smov 0  }
   0x4   :  { %s634_s14 = smov 0   ;;  %s636_s15 = smov 0  }
   0x5   :  { %s638_s16 = smov 0   ;;  %s640_s17 = smov 0  }
   0x6 LB: > { %s407_s18 = sadd.s32 4294967295, %s604_s17   ;;  %s408_s19 = sadd.s32 4294967294, %s604_s17   ;;  %s604_s17 = sphi %s640_s17, %s19_s17   ;;  %s600_s16 = sphi %s638_s16, %s789_s16   ;;  %s596_s15 = sphi %s636_s15, %s788_s15   ;;  %s592_s14 = sphi %s634_s14, %s787_s14   ;;  %s588_s13 = sphi %s632_s13, %s786_s13   ;;  %s584_s12 = sphi %s630_s12, %s785_s12  }
   0x7   : > { %s31_s20 = sadd.s32 1, %s600_s16  ;;  %s40_s21 = sadd.s32 1, %s592_s14 }
   0x8   : > { %p33_p0 = scmp.ge.s32.totalorder %s31_s20, 2  ;;  %p47_p1 = scmp.ne.s32.totalorder %s592_s14, %s588_s13 }
   0x9   : > { %p48_p2 = scmp.eq.s32.totalorder %s604_s17, 0  ;;  %p53_p3 = scmp.ne.s32.totalorder %s588_s13, %s584_s12 }
   0xa   : > { %s791_s20 = smov (%p33_p0, %s31_s20), 0  ;;  %p54_p5 = scmp.eq.s32.totalorder %s407_s18, 0 }
   0xb   : > { %p671_p4 = por %p48_p2, %p47_p1  ;;  %s35_s23 = ssub.s32 %s600_s16, %s791_s20 }
   0xc   : > { %p121_p6 = scmp.eq.s32.totalorder %s407_s18, 1  ;;  %p38_p7 = scmp.eq.s32.totalorder %s35_s23, 0 }
   0xd   : > { %p677_p8 = por %p54_p5, %p53_p3  ;;  %p127_p10 = scmp.eq.s32.totalorder %s408_s19, 1 }
   0xe   : > { %p681_p9 = por %p121_p6, %p47_p1  ;;  %p439_p13 = scmp.lt.s32.totalorder %s604_s17, 2 }
   0xf   : > { %s686_s26 = scalar_select %p38_p7, %s592_s14, %s40_s21  }
  0x10   : > { %p688_p11 = por %p127_p10, %p53_p3  ;;  %s153_s28 = sand.u32 1, %s592_s14  }
  0x11   : > { %s411_s29 = sshll.u32 %s153_s28, 3  ;;  %s425_s30 = sshll.u32 %s600_s16, 7 }
  0x12   : > { %s781_s27 = scalar_select %p688_p11, 1, 0 }
  0x13   : > { %s165_s6 = scalar_lea.hbm %s774_s0, %s425_s30  ;;  %s157_s7 = scalar_lea.vmem [#allocation2], %s411_s29 }
  0x14   : > { %s167_s8 = sshll.u32 %s157_s7, 4  ;;  %p701_p0 = pnand %p439_p13, %p671_p4  ;;  %s168_s8 = int_to_ptr.vmem [resolvable:$true] %s167_s8 }
  0x15   : > { %p414_p1 = scmp.ge.s32.totalorder %s604_s17, 1  ;;  %p172_p2 = scmp.lt.s32.totalorder %s604_s17, 3 }
  0x16   : > { %s154_s10 = scalar_lea.sflag [#allocation3], %s153_s28  ;;  %p498_p3 = pneg %p701_p0 }
  0x17   : > { %s509_s11 = scalar_lea.vmem %s168_s8, 128  ;;  %s606_s18 = smov [#allocation2]  }
  0x18   : > { %p510_p5 = scmp.ne.s32.totalorder %s168_s8, %s509_s11  ;;  %s514_s19 = sshll.u32 %s606_s18, 4  ;;  %s515_s19 = int_to_ptr.vmem [resolvable:$false] %s514_s19 }
  0x19   : > { %s516_s21 = scalar_lea.vmem %s515_s19, 256  ;;  %p517_p10 = scmp.lt.s32.totalorder %s168_s8, %s515_s19 }
  0x1a   : > { %p512_p6 = pnand %p510_p5, %p498_p3  ;;  %p518_p12 = scmp.lt.s32.totalorder %s516_s21, %s509_s11 }
  0x1c   : > { %p513_p7 = pneg %p512_p6  ;;  %p519_p4 = por %p518_p12, %p517_p10 }
  0x1e   : > { %p520_p13 = pnand %p519_p4, %p513_p7 }
  0x20   : > { %523 = shalt.err (!%p520_p13)
}
  0x21   : > { %434 = dma.hbm_to_vmem [thread:$0]  (!%p701_p0), %s165_s6, 128, %s168_s8, %s154_s10  }
  0x22   : > { %p173_p11 = pnand %p414_p1, %p172_p2 }
  0x23   : > { %s716_s22 = sand.u32 (!%p173_p11), 1, %s588_s13  }
  0x24   : > { %176 = sbr.rel (%p173_p11) target bundleno = 277 (0x115), region = 32  ;;  %s415_s23 = sshll.u32 (!%p173_p11), %s716_s22, 3 }
  0x25   : > { %s179_s28 = scalar_lea.sflag (!%p173_p11), [#allocation3], %s716_s22  ;;  %s182_s29 = scalar_lea.vmem (!%p173_p11), [#allocation2], %s415_s23 }
  0x29   : > { %575 = dma.done.wait (%p677_p8), %s179_s28, 128  }
  0x2a   : > { %577 = vsyncadd (%p677_p8), %s179_s28, 4294967168  ;;  %v607_v0 = vmov 0.0   ;;  %v608_v1 = vmov 0   ;;  %v207_v2 = vld [vmem:[%s182_s29] sm:$0xff]  ;;  %vm222_vm0 = vcmask 1043456   ;;  %vm218_vm1 = vcmask 31744  }
  0x2b   : > { %291 = vmatprep.mubr.f32.mxu0 %v607_v0  ;;  %491 = vset.pattern.permute.xlu0 %v608_v1  ;;  %v210_v3 = vld [vmem:[%s776_s2] sm:$0xf]  ;;  %v208_v4 = vmul.f32 %v207_v2, %v207_v2  ;;  %s426_s24 = sshll.u32 %s596_s15, 7  ;;  %s204_s7 = scalar_lea.vmem [#allocation5], %s415_s23 }
  0x2c   : > { %213 = vperm.xlu0 %491, %v210_v3   ;;  %v209_v6 = vld [vmem:[%s775_s1] sm:$0xf]  ;;  %s323_s8 = sshll.u32 %s204_s7, 4  ;;  %s321_s11 = scalar_lea.hbm %s777_s3, %s426_s24  ;;  %s324_s8 = int_to_ptr.vmem [resolvable:$true] %s323_s8 }
  0x2d   : > { %v217_v5 = vcombine.high %v208_v4, %v208_v4  ;;  %s307_s18 = scalar_lea.sflag [#allocation4], %s716_s22  ;;  %s524_s19 = scalar_lea.vmem %s324_s8, 128 }
  0x2e   : > { %p525_p8 = scmp.ne.s32.totalorder %s324_s8, %s524_s19  ;;  %s609_s21 = smov [#allocation5]  }
  0x2f   : > { %417 = vmatprep.subr.msk.mxu0 %vm222_vm0, %v217_v5  ;;  %s528_s28 = sshll.u32 %s609_s21, 4  ;;  %s529_s28 = int_to_ptr.vmem [resolvable:$false] %s528_s28 }
  0x30   : > { %418 = vmatpush1.msk.msra.mxu0 %vm222_vm0, %v208_v4  ;;  %p526_p11 = pnand %p525_p8, %p681_p9  ;;  %s530_s15 = scalar_lea.vmem %s529_s28, 256 }
  0x31   : > { %419 = vmatmul.mubr.msk.f32.vlgmr.msra.gmra.mxu0 %vm218_vm1, %v209_v6  ;;  %p531_p0 = scmp.lt.s32.totalorder %s324_s8, %s529_s28  ;;  %p532_p1 = scmp.lt.s32.totalorder %s530_s15, %s524_s19 }
  0x32   : > { %p527_p12 = pneg %p526_p11 }
  0x33   : > { %p533_p2 = por %p532_p1, %p531_p0 }
  0x35   : > { %p534_p3 = pnand %p533_p2, %p527_p12 }
  0xa7   : > { %v214_v7 = vpop.permute.xlu0 %213 }
  0xf1   : > { %v293_v8 = vpop.f32.mrf.mxu0 }
  0xf2   : > { %v294_v9 = vadd.f32 %v293_v8, %v214_v7 }
  0xf3   : > { %v295_v10 = vpop.f32.mrf.mxu0 }
  0xf4   : > { %v296_v11 = vadd.f32 %v295_v10, %v214_v7  ;;  %492 = vrsqrt.f32 %v294_v9 }
  0xf6   : > { %494 = vrsqrt.f32 %v296_v11 }
 0x101   : > { %v493_v12 = vpop.eup %492 }
 0x103   : > { %v495_v13 = vpop.eup %494 }
 0x104   : > { %v302_v14 = vcombine.low %v493_v12, %v495_v13 }
 0x106   : > { %v304_v15 = vmul.f32 %v302_v14, %v207_v2 }
 0x108   : > { %305 = vst [vmem:[%s204_s7] sm:$0xff] %v304_v15 }
 0x109   : > { %537 = shalt.err (!%p534_p3)
}
 0x10a   : > { %s538_s23 = scalar_lea.hbm %s321_s11, 128  ;;  %s542_s30 = scalar_lea.hbm %s777_s3, 256 }
 0x10b   : > { %p539_p5 = scmp.ne.s32.totalorder %s321_s11, %s538_s23  ;;  %p543_p10 = scmp.lt.s32.totalorder %s321_s11, %s777_s3 }
 0x10c   : > { %p544_p4 = scmp.lt.s32.totalorder %s542_s30, %s538_s23 }
 0x10d   : > { %p540_p6 = pnand %p539_p5, %p681_p9 }
 0x10e   : > { %p545_p13 = por %p544_p4, %p543_p10 }
 0x10f   : > { %p541_p7 = pneg %p540_p6 }
 0x111   : > { %p546_p8 = pnand %p545_p13, %p541_p7 }
 0x113   : > { %549 = shalt.err (!%p546_p8)
}
 0x114   : > { %429 = dma.vmem_to_hbm [thread:$0]  (%p681_p9), %s324_s8, 128, %s321_s11, %s307_s18  }
 0x115 PF: > { %s335_s6 = sand.u32 1, %s584_s12   ;;  %p783_p11 = scmp.ne.s32.totalorder %s781_s27, 0 }
 0x116   : > { %p784_p12 = scmp.ge.s32.totalorder %s604_s17, 2  ;;  %s336_s24 = scalar_lea.sflag [#allocation4], %s335_s6 }
 0x118   : > { %p436_p0 = pnand %p784_p12, %p783_p11 }
 0x11a   : > { %p437_p1 = pneg %p436_p0 }
 0x11c   : > { %579 = dma.done.wait (%p437_p1), %s336_s24, 128  }
 0x11d   : > { %581 = vsyncadd (%p437_p1), %s336_s24, 4294967168  ;;  %s19_s17 = sadd.s32 1, %s604_s17   ;;  %s785_s12 = smov %s588_s13 }
 0x11e   : > { %p16_p2 = scmp.ge.s32.totalorder %s19_s17, 4   ;;  %s786_s13 = smov %s592_s14 }
 0x11f   : > { %s787_s14 = smov %s686_s26  ;;  %s788_s15 = smov %s600_s16 }
 0x120   : > { %s789_s16 = smov %s791_s20  ;;  %18 = sbr.rel (!%p16_p2) target bundleno = 6 (0x6), region = 77 }
 0x125   :  { %341 = vsyncpa [#allocation3], 1 }
 0x126   :  { %343 = vsyncpa [#allocation3 + $0x1], 1 }
 0x127   :  { %344 = vsyncpa [#allocation4], 1 }
 0x128   :  { %346 = vsyncpa [#allocation4 + $0x1], 1 }

</bundles_post_ra>
